<compile_context>
chip_gen: v7x
topology: tpu7x:2x2x1
jax: 0.10.0
libtpu: 0.0.40
codegen_flags: <defaults>
</compile_context>

<pallas_src>
import jax
import jax.numpy as jnp
import numpy as np
from jax.experimental import pallas as pl
from jax.experimental.pallas import tpu as pltpu


# ---------------------------------------------------------------------------
# Path 1: true no-op — output aliases the input HBM buffer.
# ---------------------------------------------------------------------------
def _identity_alias_kernel(x_hbm_ref, o_hbm_ref):
    # o aliases x in HBM (input_output_aliases={0: 0}); the identity forward
    # needs no data movement and no compute, so the body is intentionally empty.
    del x_hbm_ref, o_hbm_ref


def _identity_alias(x):
    return pl.pallas_call(
        _identity_alias_kernel,
        out_shape=jax.ShapeDtypeStruct(x.shape, x.dtype),
        in_specs=[pl.BlockSpec(memory_space=pl.ANY)],   # stay in HBM, no auto-DMA
        out_specs=pl.BlockSpec(memory_space=pl.ANY),
        input_output_aliases={0: 0},                    # out buffer == in buffer
    )(x)


# ---------------------------------------------------------------------------
# Path 2: fresh output buffer via direct HBM->HBM DMA (no VMEM staging).
# ---------------------------------------------------------------------------
def _make_dma_copy_kernel(chunk_bounds):
    """Kernel factory: issue one HBM->HBM DMA per static chunk, then wait all."""
    def kernel(x_hbm, o_hbm, sems):
        copies = []
        for i, (start, size) in enumerate(chunk_bounds):
            cp = pltpu.make_async_copy(
                x_hbm.at[pl.ds(start, size)],
                o_hbm.at[pl.ds(start, size)],
                sems.at[i],
            )
            cp.start()
            copies.append(cp)
        # All descriptors are in flight before the first wait -> they overlap.
        for cp in copies:
            cp.wait()
    return kernel


def _identity_copy(x):
    orig_shape = x.shape
    x_nd = x.reshape(1) if x.ndim == 0 else x
    lead = x_nd.shape[0]
    itemsize = jnp.dtype(x.dtype).itemsize
    nbytes = x_nd.size * itemsize

    # A handful of in-flight DMA descriptors is enough to reach the HBM copy
    # roofline on every generation; more only adds issue overhead.
    if nbytes >= (8 << 20):
        target_chunks = 4
    elif nbytes >= (1 << 20):
        target_chunks = 2
    else:
        target_chunks = 1
    num_chunks = max(1, min(target_chunks, lead))

    # Static, contiguous chunk bounds along the leading axis.
    chunk_bounds = []
    base, rem, start = lead // num_chunks, lead % num_chunks, 0
    for i in range(num_chunks):
        size = base + (1 if i < rem else 0)
        if size > 0:
            chunk_bounds.append((start, size))
        start += size

    out = pl.pallas_call(
        _make_dma_copy_kernel(tuple(chunk_bounds)),
        out_shape=jax.ShapeDtypeStruct(x_nd.shape, x.dtype),
        in_specs=[pl.BlockSpec(memory_space=pl.ANY)],    # raw HBM ref in
        out_specs=pl.BlockSpec(memory_space=pl.ANY),     # raw HBM ref out
        scratch_shapes=[pltpu.SemaphoreType.DMA((len(chunk_bounds),))],
        cost_estimate=pl.CostEstimate(
            flops=0, transcendentals=0, bytes_accessed=2 * nbytes),
    )(x_nd)
    return out.reshape(orig_shape)


# ---------------------------------------------------------------------------
# Public wrapper (API parity with the PyTorch module).
# ---------------------------------------------------------------------------
def dummy_layer_norm(x, normalized_shape=None, eps=1e-5, *, alias_input=True):
    """Pallas equivalent of DummyLayerNorm.forward (identity).

    normalized_shape / eps are accepted for API parity but unused, exactly as
    in the PyTorch module.  With alias_input=True (default) the output aliases
    the input HBM buffer (zero traffic only when the caller donates the input,
    e.g. jax.jit(..., donate_argnums=...); otherwise XLA inserts one defensive
    copy).  With alias_input=False a fresh output buffer is produced by a
    direct HBM->HBM DMA copy (no VMEM staging).
    """
    del normalized_shape, eps  # intentionally unused, as in the PyTorch module
    if x.size == 0:
        return x
    if alias_input:
        return _identity_alias(x)
    return _identity_copy(x)


if __name__ == "__main__":
    key = jax.random.PRNGKey(0)
    # batch=2, seq=8, hidden=32 — consistent with a LayerNorm-style input.
    x = jax.random.normal(key, (2, 8, 32), dtype=jnp.float32)
    x_host = np.asarray(x)  # host copy for verification (survives donation)

    # 1) Fresh-output path: direct HBM->HBM DMA copy (single chunk at this size).
    y_copy = jax.block_until_ready(
        dummy_layer_norm(x, normalized_shape=(32,), eps=1e-5, alias_input=False))
    assert y_copy.shape == x.shape and y_copy.dtype == x.dtype
    assert np.array_equal(np.asarray(y_copy), x_host)

    # 1b) Exercise the multi-chunk DMA path (>= 1 MiB -> 2 chunks).
    x_big = jax.random.normal(jax.random.PRNGKey(1), (4, 256, 256),
                              dtype=jnp.float32)
    y_big = jax.block_until_ready(
        dummy_layer_norm(x_big, normalized_shape=(256,), alias_input=False))
    assert np.array_equal(np.asarray(y_big), np.asarray(x_big))

    # 2) Zero-traffic path: output aliases the donated input buffer.
    fwd = jax.jit(
        lambda a: dummy_layer_norm(a, normalized_shape=(32,), eps=1e-5,
                                   alias_input=True),
        donate_argnums=(0,))
    y_alias = jax.block_until_ready(fwd(x))  # x is donated; use x_host below
    assert y_alias.shape == x_host.shape and y_alias.dtype == jnp.float32
    assert np.array_equal(np.asarray(y_alias), x_host)

    print("KERNEL_OK")
</pallas_src>

<mosaic_0001>
module attributes {stable_mosaic.version = 11 : i64} {
  func.func @kernel(%arg0: memref<2x8x32xf32, #tpu.memory_space<any>>, %arg1: memref<2x8x32xf32, #tpu.memory_space<any>>, %arg2: memref<1x!tpu.dma_semaphore, #tpu.memory_space<semaphore_mem>>) attributes {dimension_semantics = [], scalar_prefetch = 0 : i64, scratch_operands = 1 : i64, tpu.core_type = #tpu.core_type<tc>} {
    %c0_i32 = arith.constant 0 : i32
    %c0_i32_0 = arith.constant 0 : i32
    %c0_i32_1 = arith.constant 0 : i32
    %c0_i32_2 = arith.constant 0 : i32
    %0 = tpu.memref_slice %arg0[%c0_i32_0, %c0_i32_1, %c0_i32_2] : memref<2x8x32xf32, #tpu.memory_space<any>> -> memref<2x8x32xf32, #tpu.memory_space<any>>
    %c0_i32_3 = arith.constant 0 : i32
    %c0_i32_4 = arith.constant 0 : i32
    %c0_i32_5 = arith.constant 0 : i32
    %1 = tpu.memref_slice %arg1[%c0_i32_3, %c0_i32_4, %c0_i32_5] : memref<2x8x32xf32, #tpu.memory_space<any>> -> memref<2x8x32xf32, #tpu.memory_space<any>>
    %2 = tpu.memref_slice %arg2[%c0_i32] : memref<1x!tpu.dma_semaphore, #tpu.memory_space<semaphore_mem>> -> memref<1x!tpu.dma_semaphore, #tpu.memory_space<semaphore_mem>>
    %3 = tpu.memref_squeeze %2 : memref<1x!tpu.dma_semaphore, #tpu.memory_space<semaphore_mem>> -> memref<!tpu.dma_semaphore, #tpu.memory_space<semaphore_mem>>
    tpu.enqueue_dma source(%0 : memref<2x8x32xf32, #tpu.memory_space<any>>) target(%1 : memref<2x8x32xf32, #tpu.memory_space<any>>) target_semaphore(%3 : memref<!tpu.dma_semaphore, #tpu.memory_space<semaphore_mem>>)
    %c0_i32_6 = arith.constant 0 : i32
    %c0_i32_7 = arith.constant 0 : i32
    %c0_i32_8 = arith.constant 0 : i32
    %c0_i32_9 = arith.constant 0 : i32
    %4 = tpu.memref_slice %arg0[%c0_i32_7, %c0_i32_8, %c0_i32_9] : memref<2x8x32xf32, #tpu.memory_space<any>> -> memref<2x8x32xf32, #tpu.memory_space<any>>
    %c0_i32_10 = arith.constant 0 : i32
    %c0_i32_11 = arith.constant 0 : i32
    %c0_i32_12 = arith.constant 0 : i32
    %5 = tpu.memref_slice %arg1[%c0_i32_10, %c0_i32_11, %c0_i32_12] : memref<2x8x32xf32, #tpu.memory_space<any>> -> memref<2x8x32xf32, #tpu.memory_space<any>>
    %6 = tpu.memref_slice %arg2[%c0_i32_6] : memref<1x!tpu.dma_semaphore, #tpu.memory_space<semaphore_mem>> -> memref<1x!tpu.dma_semaphore, #tpu.memory_space<semaphore_mem>>
    %7 = tpu.memref_squeeze %6 : memref<1x!tpu.dma_semaphore, #tpu.memory_space<semaphore_mem>> -> memref<!tpu.dma_semaphore, #tpu.memory_space<semaphore_mem>>
    tpu.wait_dma2 semaphore(%7 : memref<!tpu.dma_semaphore, #tpu.memory_space<semaphore_mem>>) src(%4 : memref<2x8x32xf32, #tpu.memory_space<any>>) dst(%5 : memref<2x8x32xf32, #tpu.memory_space<any>>)
    return
  }
}

</mosaic_0001>

<bundles_post_ra>
// kernel: tpu_custom_call.1
= control target key start
LH: loop header
LB: loop body
LE: loop exit
PB: predicated region body
PF: predicated region fallthrough
CT: control target
= control target key end

     0   :  { %s35_s6 = smov [#allocation2]   ;;  %s36_s7 = smov [#allocation3]   ;;  %s54_s0 = inlined_call_operand.hbm [shape: f32[2,8,32], index: 0, kind: input, shape index: {}]   ;;  %s55_s1 = inlined_call_operand.hbm [shape: f32[2,8,32], index: 1, kind: output, shape index: {}]  }
   0x1   :  { %s37_s8 = smov 0  }
   0x2   :  { %18 = dma.general %s54_s0, 256, %s55_s1, %s35_s6, %s36_s7, [#allocation4], %s37_s8, 0  }
   0x3   :  { %33 = dma.done.wait [#allocation2], 256 }
   0x4   :  { %34 = vsyncadd [#allocation2], 4294967040 }
   0x5   :  { %23 = vsyncmov [#allocation2] }
   0x8   :  { %s24_s13 = vpop.sfrf %23 }
   0x9   :  { %p29_p0 = scmp.ne.s32.totalorder %s24_s13, 0 }
   0xb   :  { %28 = shalt.err (%p29_p0)  }

</bundles_post_ra>
